<compile_context>
chip_gen: v5e
topology: v5e:2x2
jax: 0.10.0
libtpu: 0.0.40
codegen_flags: <defaults>
</compile_context>

<pallas_src>
import functools

import jax
import jax.numpy as jnp
from jax.experimental import pallas as pl
from jax.experimental.pallas import tpu as pltpu


def _round_up(x, m):
    return (x + m - 1) // m * m


def _choose_tk(kp):
    """kp is a multiple of 128; pick a K-tile that divides it exactly."""
    if kp <= 2048:
        return kp
    for c in (2048, 1536, 1280, 1152, 1024, 896, 768, 640, 512, 384, 256, 128):
        if kp % c == 0:
            return c
    return 128


# ----------------------------------------------------------------------------
# Pallas kernel: tiled matmul (bf16 -> f32 acc) with fused per-channel affine,
# optional residual add, optional ReLU.
# ----------------------------------------------------------------------------
def _matmul_affine_kernel(a_ref, b_ref, scale_ref, shift_ref, *refs,
                          apply_relu, has_residual):
    if has_residual:
        res_ref, o_ref, acc_ref = refs
    else:
        o_ref, acc_ref = refs
        res_ref = None

    k = pl.program_id(2)

    @pl.when(k == 0)
    def _():
        acc_ref[...] = jnp.zeros_like(acc_ref)

    acc_ref[...] += jnp.dot(a_ref[...], b_ref[...],
                            preferred_element_type=jnp.float32)

    @pl.when(k == pl.num_programs(2) - 1)
    def _():
        y = acc_ref[...] * scale_ref[...] + shift_ref[...]
        if has_residual:
            y = y + res_ref[...].astype(jnp.float32)
        if apply_relu:
            y = jnp.maximum(y, 0.0)
        o_ref[...] = y.astype(o_ref.dtype)


def matmul_affine(a, b, scale, shift, residual=None, *, relu=False,
                  out_dtype=jnp.bfloat16):
    """out = maybe_relu(a @ b * scale + shift [+ residual]).

    a:(M,K) b:(K,N) scale/shift:(N,) residual:(M,N)|None.
    MXU operands in bf16; accumulation and epilogue math in f32.
    """
    M, K = a.shape
    N = b.shape[1]

    # M: pad only to the bf16 sublane granule (16) when small; tile at 256.
    if M <= 256:
        Mp = _round_up(M, 16)
        tm = Mp
    else:
        tm = 256
        Mp = _round_up(M, tm)
    tn = min(256, _round_up(N, 128))
    Np = _round_up(N, tn)
    Kp = _round_up(K, 128)
    tk = _choose_tk(Kp)

    a_p = jnp.pad(a.astype(jnp.bfloat16), ((0, Mp - M), (0, Kp - K)))
    b_p = jnp.pad(b.astype(jnp.bfloat16), ((0, Kp - K), (0, Np - N)))
    s_p = jnp.pad(scale.astype(jnp.float32), (0, Np - N)).reshape(1, Np)
    t_p = jnp.pad(shift.astype(jnp.float32), (0, Np - N)).reshape(1, Np)

    in_specs = [
        pl.BlockSpec((tm, tk), lambda i, j, k: (i, k)),
        pl.BlockSpec((tk, tn), lambda i, j, k: (k, j)),
        pl.BlockSpec((1, tn), lambda i, j, k: (0, j)),
        pl.BlockSpec((1, tn), lambda i, j, k: (0, j)),
    ]
    operands = [a_p, b_p, s_p, t_p]
    if residual is not None:
        r_p = jnp.pad(residual.astype(jnp.bfloat16),
                      ((0, Mp - M), (0, Np - N)))
        in_specs.append(pl.BlockSpec((tm, tn), lambda i, j, k: (i, j)))
        operands.append(r_p)

    kernel = functools.partial(_matmul_affine_kernel, apply_relu=relu,
                               has_residual=residual is not None)
    grid = (Mp // tm, Np // tn, Kp // tk)

    out = pl.pallas_call(
        kernel,
        out_shape=jax.ShapeDtypeStruct((Mp, Np), out_dtype),
        grid_spec=pltpu.PrefetchScalarGridSpec(
            num_scalar_prefetch=0,
            grid=grid,
            in_specs=in_specs,
            out_specs=pl.BlockSpec((tm, tn), lambda i, j, k: (i, j)),
            scratch_shapes=[pltpu.VMEM((tm, tn), jnp.float32)],
        ),
        compiler_params=pltpu.CompilerParams(
            dimension_semantics=("parallel", "parallel", "arbitrary")),
    )(*operands)
    if Mp != M or Np != N:
        out = out[:M, :N]
    return out


# ----------------------------------------------------------------------------
# Conv2d = im2col (glue, fused under jit) + Pallas matmul with fused epilogue
# ----------------------------------------------------------------------------
def _extract_patches(x, kh, kw, stride, pads):
    # x: (N, H, W, C); pads = (top, bottom, left, right)
    n, h, w, c = x.shape
    pt, pb, plf, pr = pads
    xp = jnp.pad(x, ((0, 0), (pt, pb), (plf, pr), (0, 0)))
    hp, wp = h + pt + pb, w + plf + pr
    oh = (hp - kh) // stride + 1
    ow = (wp - kw) // stride + 1
    if kh == 1 and kw == 1 and stride == 1:
        return xp, oh, ow
    cols = []
    for i in range(kh):
        for j in range(kw):
            cols.append(xp[:, i:i + stride * (oh - 1) + 1:stride,
                           j:j + stride * (ow - 1) + 1:stride, :])
    # TODO(synk): patches are still materialized (9x/49x) before the kernel;
    # an in-kernel shifted-window read would avoid this HBM blowup.
    return jnp.concatenate(cols, axis=-1), oh, ow


@functools.partial(jax.jit, static_argnames=("relu", "stride", "pads"))
def conv2d(x, w, bias=None, bn=None, residual=None, *, relu=False, stride=1,
           pads=(0, 0, 0, 0)):
    """x: NHWC, w: (kh,kw,cin,cout) bf16.  Eval-BN + bias (+ residual, + ReLU)
    all fused into the Pallas matmul epilogue."""
    kh, kw, cin, cout = w.shape
    x = x.astype(jnp.bfloat16)
    patches, oh, ow = _extract_patches(x, kh, kw, stride, pads)
    n = x.shape[0]
    a = patches.reshape(n * oh * ow, kh * kw * cin)
    bmat = w.reshape(kh * kw * cin, cout).astype(jnp.bfloat16)
    if bn is not None:
        scale, shift = bn
    else:
        scale = jnp.ones((cout,), jnp.float32)
        shift = jnp.zeros((cout,), jnp.float32)
    if bias is not None:
        shift = shift + bias * scale
    res2d = None
    if residual is not None:
        res2d = residual.reshape(n * oh * ow, cout)
    out = matmul_affine(a, bmat, scale, shift, res2d, relu=relu)
    return out.reshape(n, oh, ow, cout)


def maxpool_3x3_s2_p1(x):
    # Small reduction; done in plain JAX (glue), bf16.
    n, h, w, c = x.shape
    xp = jnp.pad(x, ((0, 0), (1, 1), (1, 1), (0, 0)),
                 constant_values=-jnp.inf)
    oh = (h + 2 - 3) // 2 + 1
    ow = (w + 2 - 3) // 2 + 1
    vals = []
    for i in range(3):
        for j in range(3):
            vals.append(xp[:, i:i + 2 * (oh - 1) + 1:2,
                           j:j + 2 * (ow - 1) + 1:2, :])
    return jnp.max(jnp.stack(vals, 0), 0)


# ----------------------------------------------------------------------------
# Deterministic parameter construction (shapes from the PyTorch __init__)
# ----------------------------------------------------------------------------
def bn_params(c, eps=1e-5):
    gamma = jnp.ones((c,), jnp.float32)
    beta = jnp.zeros((c,), jnp.float32)
    mean = jnp.zeros((c,), jnp.float32)
    var = jnp.ones((c,), jnp.float32)
    scale = gamma / jnp.sqrt(var + eps)
    shift = beta - mean * scale
    return scale, shift


class ParamGen:
    def __init__(self, key):
        self.key = key
        self.cnt = 0

    def conv_w(self, kh, kw, cin, cout):
        # nn.init.normal_(weight, 0, 0.01); stored HWIO (NHWC compute), bf16.
        self.cnt += 1
        k = jax.random.fold_in(self.key, self.cnt)
        w = 0.01 * jax.random.normal(k, (kh, kw, cin, cout), jnp.float32)
        return w.astype(jnp.bfloat16)

    def conv_b(self, cout):
        return jnp.zeros((cout,), jnp.float32)


def make_bottleneck_params(p, cin, planes, stride, downsample):
    d = dict(
        w1=p.conv_w(1, 1, cin, planes), bn1=bn_params(planes),
        w2=p.conv_w(3, 3, planes, planes), bn2=bn_params(planes),
        w3=p.conv_w(1, 1, planes, planes * 4), bn3=bn_params(planes * 4),
        stride=stride,
    )
    if downsample:
        d["wd"] = p.conv_w(1, 1, cin, planes * 4)
        d["bnd"] = bn_params(planes * 4)
    return d


def bottleneck_forward(x, d):
    out = conv2d(x, d["w1"], bn=d["bn1"], relu=True)
    out = conv2d(out, d["w2"], bn=d["bn2"], relu=True,
                 stride=d["stride"], pads=(1, 1, 1, 1))
    if "wd" in d:
        residual = conv2d(x, d["wd"], bn=d["bnd"], stride=d["stride"])
    else:
        residual = x
    # conv3 + BN + residual add + ReLU fused into a single kernel epilogue.
    return conv2d(out, d["w3"], bn=d["bn3"], residual=residual, relu=True)


def make_unpool_params(p, cin, cout):
    # The four branch convs (3x3 / 2x3 / 3x2 / 2x2) are fused into ONE 3x3
    # conv with 4*cout output channels.  Zero-padding the smaller kernels up
    # to 3x3 exactly reproduces the asymmetric input paddings used by the
    # PyTorch module, so a single pads=(1,1,1,1) conv is mathematically
    # identical to the four separate convs.
    wA = p.conv_w(3, 3, cin, cout)
    wB = jnp.pad(p.conv_w(2, 3, cin, cout), ((1, 0), (0, 0), (0, 0), (0, 0)))
    wC = jnp.pad(p.conv_w(3, 2, cin, cout), ((0, 0), (1, 0), (0, 0), (0, 0)))
    wD = jnp.pad(p.conv_w(2, 2, cin, cout), ((1, 0), (1, 0), (0, 0), (0, 0)))
    w = jnp.concatenate([wA, wB, wC, wD], axis=-1)
    b = jnp.concatenate([p.conv_b(cout)] * 4)
    return dict(w=w, b=b, cout=cout)


def interleave4(a, b, c, d):
    # y[2i,2j]=a  y[2i+1,2j]=b  y[2i,2j+1]=c  y[2i+1,2j+1]=d   (NHWC)
    n, h, w, ch = a.shape
    left = jnp.stack([a, b], axis=2).reshape(n, 2 * h, w, ch)
    right = jnp.stack([c, d], axis=2).reshape(n, 2 * h, w, ch)
    return jnp.stack([left, right], axis=3).reshape(n, 2 * h, 2 * w, ch)


def unpool_forward(x, d, bn, relu):
    # BN / ReLU are per-channel elementwise, so they commute with the
    # interleave; fold them into the fused conv's epilogue (tiled 4x).
    cout = d["cout"]
    scale, shift = bn
    bn4 = (jnp.tile(scale, 4), jnp.tile(shift, 4))
    y = conv2d(x, d["w"], bias=d["b"], bn=bn4, relu=relu, pads=(1, 1, 1, 1))
    a = y[..., 0 * cout:1 * cout]
    b = y[..., 1 * cout:2 * cout]
    c = y[..., 2 * cout:3 * cout]
    e = y[..., 3 * cout:4 * cout]
    return interleave4(a, b, c, e)


def make_upproj_params(p, cin, cout):
    return dict(
        unpool_main=make_unpool_params(p, cin, cout),
        bn_main1=bn_params(cout),
        w_conv=p.conv_w(3, 3, cout, cout), b_conv=p.conv_b(cout),
        bn_main2=bn_params(cout),
        unpool_res=make_unpool_params(p, cin, cout),
        bn_res=bn_params(cout),
    )


def upproj_forward(x, d):
    m = unpool_forward(x, d["unpool_main"], bn=d["bn_main1"], relu=True)
    r = unpool_forward(x, d["unpool_res"], bn=d["bn_res"], relu=False)
    # 3x3 conv + BN + residual add + ReLU fused into a single kernel epilogue.
    return conv2d(m, d["w_conv"], bias=d["b_conv"], bn=d["bn_main2"],
                  residual=r, relu=True, pads=(1, 1, 1, 1))


def make_conconv_params(p, cin_x1, cin_x2, cout):
    return dict(w=p.conv_w(1, 1, cin_x1 + cin_x2, cout), b=p.conv_b(cout))


def conconv_forward(x1, x2, d):
    x = jnp.concatenate([x2, x1], axis=-1)  # torch.cat([x2, x1], dim=1)
    return conv2d(x, d["w"], bias=d["b"])


def make_model_params(key, layers=(1, 1, 1, 1), input_channels=3):
    # TODO(synk): parse_config reads 'input_channels' from src/config.cfg;
    # hardcoded to 3 (RGB) here since no file I/O is allowed.
    p = ParamGen(key)
    params = {}
    params["conv1_w"] = p.conv_w(7, 7, input_channels, 64)
    params["bn1"] = bn_params(64)

    inplanes = [64]

    def make_layer(planes, blocks, stride):
        layer = []
        downsample = (stride != 1) or (inplanes[0] != planes * 4)
        layer.append(make_bottleneck_params(p, inplanes[0], planes, stride,
                                            downsample))
        inplanes[0] = planes * 4
        for _ in range(1, blocks):
            layer.append(make_bottleneck_params(p, inplanes[0], planes, 1,
                                                False))
        return layer

    params["layer1"] = make_layer(64, layers[0], 1)
    params["layer2"] = make_layer(128, layers[1], 2)
    params["layer3"] = make_layer(256, layers[2], 2)
    params["layer4"] = make_layer(512, layers[3], 2)

    params["conv2_w"] = p.conv_w(1, 1, 2048, 1024)
    params["conv2_b"] = p.conv_b(1024)
    params["bn2"] = bn_params(1024)
    params["up_proj1"] = make_upproj_params(p, 1024, 512)
    params["up_proj2"] = make_upproj_params(p, 512, 256)
    params["up_proj3"] = make_upproj_params(p, 256, 128)
    params["up_proj4"] = make_upproj_params(p, 128, 64)
    params["conv3_w"] = p.conv_w(3, 3, 64, 1)
    params["conv3_b"] = p.conv_b(1)
    params["con_conv1"] = make_conconv_params(p, 1024, 512, 512)
    params["con_conv2"] = make_conconv_params(p, 512, 256, 256)
    params["con_conv3"] = make_conconv_params(p, 256, 128, 128)
    params["con_conv4"] = make_conconv_params(p, 64, 64, 64)
    return params


# ----------------------------------------------------------------------------
# Full forward pass (mirrors ResnetUnetHybrid.forward)
# ----------------------------------------------------------------------------
def resnet_unet_hybrid_forward(x_nchw, params):
    x = jnp.transpose(x_nchw, (0, 2, 3, 1)).astype(jnp.bfloat16)  # NCHW->NHWC

    x = conv2d(x, params["conv1_w"], bn=params["bn1"], relu=True,
               stride=2, pads=(3, 3, 3, 3))
    x_to_conv4 = x
    x = maxpool_3x3_s2_p1(x_to_conv4)

    for blk in params["layer1"]:
        x = bottleneck_forward(x, blk)
    x_to_conv3 = x
    for blk in params["layer2"]:
        x = bottleneck_forward(x, blk)
    x_to_conv2 = x
    for blk in params["layer3"]:
        x = bottleneck_forward(x, blk)
    x_to_conv1 = x
    for blk in params["layer4"]:
        x = bottleneck_forward(x, blk)

    x = conv2d(x, params["conv2_w"], bias=params["conv2_b"],
               bn=params["bn2"], relu=False)

    x = upproj_forward(x, params["up_proj1"])
    x = conconv_forward(x, x_to_conv1, params["con_conv1"])
    x = upproj_forward(x, params["up_proj2"])
    x = conconv_forward(x, x_to_conv2, params["con_conv2"])
    x = upproj_forward(x, params["up_proj3"])
    x = conconv_forward(x, x_to_conv3, params["con_conv3"])
    x = upproj_forward(x, params["up_proj4"])
    x = conconv_forward(x, x_to_conv4, params["con_conv4"])

    # TODO(synk): nn.Dropout(0.5) — identity in eval mode; training-mode
    # random masking not implemented.
    x = conv2d(x, params["conv3_w"], bias=params["conv3_b"], relu=True,
               pads=(1, 1, 1, 1))
    return jnp.transpose(x, (0, 3, 1, 2)).astype(jnp.float32)  # NHWC -> NCHW


if __name__ == "__main__":
    key = jax.random.PRNGKey(0)
    # layers=(1,1,1,1): smallest valid Bottleneck instantiation (same channel
    # plan as ResNet-50's [3,4,6,3], fewer repeated blocks to keep it small).
    params = make_model_params(jax.random.fold_in(key, 1),
                               layers=(1, 1, 1, 1), input_channels=3)
    x = jax.random.normal(jax.random.fold_in(key, 2), (2, 3, 32, 32),
                          jnp.float32)
    out = resnet_unet_hybrid_forward(x, params)
    out = jax.block_until_ready(out)
    assert out.shape == (2, 1, 16, 16), out.shape
    assert bool(jnp.all(jnp.isfinite(out)))
    print("KERNEL_OK")
</pallas_src>

<mosaic_0001>
module attributes {stable_mosaic.version = 11 : i64} {
  func.func @_matmul_affine_kernel(%arg0: i32, %arg1: i32, %arg2: i32, %arg3: memref<256x256xbf16, #tpu.memory_space<vmem>>, %arg4: memref<256x128xbf16, #tpu.memory_space<vmem>>, %arg5: memref<1x128xf32, #tpu.memory_space<vmem>>, %arg6: memref<1x128xf32, #tpu.memory_space<vmem>>, %arg7: memref<256x128xbf16, #tpu.memory_space<vmem>>, %arg8: memref<256x128xf32, #tpu.memory_space<vmem>>) attributes {dimension_semantics = [#tpu.dimension_semantics<parallel>, #tpu.dimension_semantics<parallel>, #tpu.dimension_semantics<arbitrary>], iteration_bounds = array<i64: 2, 1, 1>, scalar_prefetch = 0 : i64, scratch_operands = 1 : i64, tpu.core_type = #tpu.core_type<tc>, window_params = [{transform_indices = @transform_0, window_bounds = array<i64: 256, 256>}, {transform_indices = @transform_1, window_bounds = array<i64: 256, 128>}, {transform_indices = @transform_2, window_bounds = array<i64: 1, 128>}, {transform_indices = @transform_3, window_bounds = array<i64: 1, 128>}, {transform_indices = @transform_4, window_bounds = array<i64: 256, 128>}]} {
    %c0_i32 = arith.constant 0 : i32
    %0 = arith.cmpi eq, %arg2, %c0_i32 : i32
    %1 = arith.extui %0 : i1 to i32
    %c0_i32_0 = arith.constant 0 : i32
    %2 = arith.cmpi ne, %1, %c0_i32_0 : i32
    scf.if %2 {
      %cst_10 = arith.constant 0.000000e+00 : f32
      %12 = vector.broadcast %cst_10 : f32 to vector<256x128xf32>
      %c0_11 = arith.constant 0 : index
      %c0_12 = arith.constant 0 : index
      %13 = vector.load %arg8[%c0_11, %c0_12] : memref<256x128xf32, #tpu.memory_space<vmem>>, vector<256x128xf32>
      tpu.vector_store %arg8[%c0_11, %c0_12], %12 {strides = array<i32>} : memref<256x128xf32, #tpu.memory_space<vmem>>, vector<256x128xf32>,
    } else {
    }
    %c0 = arith.constant 0 : index
    %c0_1 = arith.constant 0 : index
    %3 = vector.load %arg8[%c0, %c0_1] : memref<256x128xf32, #tpu.memory_space<vmem>>, vector<256x128xf32>
    %c0_2 = arith.constant 0 : index
    %c0_3 = arith.constant 0 : index
    %4 = vector.load %arg3[%c0_2, %c0_3] : memref<256x256xbf16, #tpu.memory_space<vmem>>, vector<256x256xbf16>
    %c0_4 = arith.constant 0 : index
    %c0_5 = arith.constant 0 : index
    %5 = vector.load %arg4[%c0_4, %c0_5] : memref<256x128xbf16, #tpu.memory_space<vmem>>, vector<256x128xbf16>
    %cst = arith.constant dense<0.000000e+00> : vector<256x128xf32>
    %6 = tpu.matmul %4, %5, %cst {dimension_numbers = #tpu.dot_dimension_numbers<[1], [0], [0], [1], [0, 0, 1, 1], [], []>} : vector<256x256xbf16>, vector<256x128xbf16>, vector<256x128xf32> -> vector<256x128xf32>
    %7 = arith.addf %3, %6 : vector<256x128xf32>
    %c0_6 = arith.constant 0 : index
    %c0_7 = arith.constant 0 : index
    %8 = vector.load %arg8[%c0_6, %c0_7] : memref<256x128xf32, #tpu.memory_space<vmem>>, vector<256x128xf32>
    tpu.vector_store %arg8[%c0_6, %c0_7], %7 {strides = array<i32>} : memref<256x128xf32, #tpu.memory_space<vmem>>, vector<256x128xf32>,
    %c0_i32_8 = arith.constant 0 : i32
    %9 = arith.cmpi eq, %arg2, %c0_i32_8 : i32
    %10 = arith.extui %9 : i1 to i32
    %c0_i32_9 = arith.constant 0 : i32
    %11 = arith.cmpi ne, %10, %c0_i32_9 : i32
    scf.if %11 {
      %c0_10 = arith.constant 0 : index
      %c0_11 = arith.constant 0 : index
      %12 = vector.load %arg8[%c0_10, %c0_11] : memref<256x128xf32, #tpu.memory_space<vmem>>, vector<256x128xf32>
      %c0_12 = arith.constant 0 : index
      %c0_13 = arith.constant 0 : index
      %13 = vector.load %arg5[%c0_12, %c0_13] : memref<1x128xf32, #tpu.memory_space<vmem>>, vector<1x128xf32>
      %14 = vector.broadcast %13 : vector<1x128xf32> to vector<256x128xf32>
      %15 = arith.mulf %12, %14 : vector<256x128xf32>
      %c0_14 = arith.constant 0 : index
      %c0_15 = arith.constant 0 : index
      %16 = vector.load %arg6[%c0_14, %c0_15] : memref<1x128xf32, #tpu.memory_space<vmem>>, vector<1x128xf32>
      %17 = vector.broadcast %16 : vector<1x128xf32> to vector<256x128xf32>
      %18 = arith.addf %15, %17 : vector<256x128xf32>
      %cst_16 = arith.constant 0.000000e+00 : f32
      %19 = vector.broadcast %cst_16 : f32 to vector<256x128xf32>
      %20 = arith.maximumf %18, %19 : vector<256x128xf32>
      %21 = arith.truncf %20 : vector<256x128xf32> to vector<256x128xbf16>
      %c0_17 = arith.constant 0 : index
      %c0_18 = arith.constant 0 : index
      %22 = vector.load %arg7[%c0_17, %c0_18] : memref<256x128xbf16, #tpu.memory_space<vmem>>, vector<256x128xbf16>
      tpu.vector_store %arg7[%c0_17, %c0_18], %21 {strides = array<i32>} : memref<256x128xbf16, #tpu.memory_space<vmem>>, vector<256x128xbf16>,
    } else {
    }
    return
  }
  func.func @transform_0(%arg0: i32, %arg1: i32, %arg2: i32) -> (i32, i32) {
    %c0_i32 = arith.constant 0 : i32
    return %arg0, %arg2 : i32, i32
  }
  func.func @transform_1(%arg0: i32, %arg1: i32, %arg2: i32) -> (i32, i32) {
    %c0_i32 = arith.constant 0 : i32
    return %arg2, %arg1 : i32, i32
  }
  func.func @transform_2(%arg0: i32, %arg1: i32, %arg2: i32) -> (i32, i32) {
    %c0_i32 = arith.constant 0 : i32
    %c0_i32_0 = arith.constant 0 : i32
    return %c0_i32, %arg1 : i32, i32
  }
  func.func @transform_3(%arg0: i32, %arg1: i32, %arg2: i32) -> (i32, i32) {
    %c0_i32 = arith.constant 0 : i32
    %c0_i32_0 = arith.constant 0 : i32
    return %c0_i32, %arg1 : i32, i32
  }
  func.func @transform_4(%arg0: i32, %arg1: i32, %arg2: i32) -> (i32, i32) {
    %c0_i32 = arith.constant 0 : i32
    return %arg0, %arg1 : i32, i32
  }
}

</mosaic_0001>

<bundles_post_ra>
// kernel: conv2d.1
= control target key start
LH: loop header
LB: loop body
LE: loop exit
PB: predicated region body
PF: predicated region fallthrough
CT: control target
= control target key end

     0   :  { %9 = vsyncpa [#allocation4], 0  ;;  %s2116_s0 = inlined_call_operand.vmem [shape: bf16[512,256], index: 0, kind: input, shape index: {}]   ;;  %s2117_s1 = inlined_call_operand.vmem [shape: bf16[256,128], index: 1, kind: input, shape index: {}]   ;;  %s2118_s2 = inlined_call_operand.vmem [shape: f32[1,128], index: 2, kind: input, shape index: {}]   ;;  %s2119_s3 = inlined_call_operand.vmem [shape: f32[1,128], index: 3, kind: input, shape index: {}]   ;;  %s2120_s4 = inlined_call_operand.hbm [shape: bf16[512,128], index: 4, kind: output, shape index: {}]  }
   0x1   :  { %11 = vsyncpa [#allocation4 + $0x1], 0  ;;  %s1809_s15 = smov 0   ;;  %s1811_s16 = smov 0  }
   0x2   :  { %s1813_s17 = smov 0   ;;  %s1815_s18 = smov 0  }
   0x3   :  { %s1817_s19 = smov 0   ;;  %s1819_s20 = smov 0  }
   0x4 LB: > { %s1273_s21 = sadd.s32 4294967295, %s1780_s20   ;;  %s1274_s22 = sadd.s32 4294967294, %s1780_s20   ;;  %s1780_s20 = sphi %s1819_s20, %s17_s20   ;;  %s1776_s19 = sphi %s1817_s19, %s2127_s19   ;;  %s1772_s18 = sphi %s1815_s18, %s2126_s18   ;;  %s1768_s17 = sphi %s1813_s17, %s2125_s17   ;;  %s1764_s16 = sphi %s1811_s16, %s2124_s16   ;;  %s1760_s15 = sphi %s1809_s15, %s2123_s15  }
   0x5   : > { %s36_s23 = sadd.s32 1, %s1776_s19  ;;  %s153_s24 = sadd.s32 1, %s1768_s17 }
   0x6   : > { %p38_p0 = scmp.ge.s32.totalorder %s36_s23, 2  ;;  %p163_p1 = scmp.ne.s32.totalorder %s1768_s17, %s1764_s16 }
   0x7   : > { %p164_p2 = scmp.eq.s32.totalorder %s1273_s21, 1  ;;  %p169_p3 = scmp.ne.s32.totalorder %s1764_s16, %s1760_s15 }
   0x8   : > { %s2129_s23 = smov (%p38_p0, %s36_s23), 0  ;;  %p170_p5 = scmp.eq.s32.totalorder %s1274_s22, 1 }
   0x9   : > { %p1849_p4 = por %p164_p2, %p163_p1  ;;  %s148_s26 = ssub.s32 %s1776_s19, %s2129_s23 }
   0xa   : > { %p1280_p6 = scmp.ge.s32.totalorder %s1780_s20, 1  ;;  %p151_p7 = scmp.eq.s32.totalorder %s148_s26, 0 }
   0xb   : > { %p1856_p8 = por %p170_p5, %p169_p3  ;;  %p227_p9 = scmp.lt.s32.totalorder %s1780_s20, 3 }
   0xc   : > { %s1862_s28 = scalar_select %p151_p7, %s1768_s17, %s153_s24  }
   0xd   : > { %p228_p10 = pnand %p1280_p6, %p227_p9 }
   0xe   : > { %s1282_s21 = sshll.u32 (!%p228_p10), %s1772_s18, 5  ;;  %s1531_s22 = sshll.u32 (!%p228_p10), %s1772_s18, 7 }
   0xf   : > { %231 = sbr.rel (%p228_p10) target bundleno = 319 (0x13f), region = 36  ;;  %p274_p11 = scmp.lt.s32.totalorder (!%p228_p10), %s1282_s21, 63 }
  0x10   : > { %s1722_s9 = scalar_lea.hbm (!%p228_p10), %s2120_s4, 256 }
  0x14   : > { %v1522_v0 = vld [vmem:[%s2117_s1 + $0x38] sm:$0xff]  ;;  %v1521_v2 = vld [vmem:[%s2117_s1 + $0x30] sm:$0xff]  ;;  %v1520_v4 = vld [vmem:[%s2117_s1 + $0x28] sm:$0xff]  ;;  %s2131_s21 = smov (!%p274_p11, %s1282_s21), 63 }
  0x15   : > { %v1530_v1 = vld [vmem:[%s2117_s1 + $0x78] sm:$0xff]  ;;  %688 = vmatpush.bf16.msra.mxu0 %v1522_v0  ;;  %1627 = vmatpush.bf16.msra.mxu2 %v1522_v0  ;;  %v1529_v3 = vld [vmem:[%s2117_s1 + $0x70] sm:$0xff]  ;;  %v1528_v5 = vld [vmem:[%s2117_s1 + $0x68] sm:$0xff]  ;;  %s1482_s12 = sshll.u32 %s2131_s21, 3  ;;  %s1146_s21 = scalar_lea.hbm %s2120_s4, %s1531_s22 }
  0x16   : > { %777 = vmatpush.bf16.msra.mxu1 %v1530_v1  ;;  %1635 = vmatpush.bf16.msra.mxu3 %v1530_v1  ;;  %v1519_v6 = vld [vmem:[%s2117_s1 + $0x20] sm:$0xff]  ;;  %v1518_v8 = vld [vmem:[%s2117_s1 + $0x18] sm:$0xff]  ;;  %v1517_v10 = vld [vmem:[%s2117_s1 + $0x10] sm:$0xff]  ;;  %s1907_s26 = scalar_lea.vmem %s2116_s0, %s1482_s12  ;;  %s269_s12 = sand.u32 1, %s1764_s16  }
  0x17   : > { %v1527_v7 = vld [vmem:[%s2117_s1 + $0x60] sm:$0xff]  ;;  %v1526_v9 = vld [vmem:[%s2117_s1 + $0x58] sm:$0xff]  ;;  %v1525_v11 = vld [vmem:[%s2117_s1 + $0x50] sm:$0xff]  ;;  %s1281_s13 = sshll.u32 %s269_s12, 7  ;;  %s1149_s29 = sshll.u32 %s1146_s21, 4  ;;  %s1150_s29 = int_to_ptr.hbm [resolvable:$true] %s1149_s29 }
  0x18   : > { %v1516_v12 = vld [vmem:[%s2117_s1 + $0x8] sm:$0xff]  ;;  %v1515_v14 = vld [vmem:[%s2117_s1] sm:$0xff]  ;;  %v1295_v28 = vld [vmem:[%s1907_s26 + $0x10] sm:$0xf]  ;;  %s2002_s14 = scalar_lea.vmem [#allocation3], %s1281_s13  ;;  %s1134_s30 = scalar_lea.sflag [#allocation4], %s269_s12 }
  0x19   : > { %689 = vmatpush.bf16.msra.mxu0 %v1521_v2  ;;  %1628 = vmatpush.bf16.msra.mxu2 %v1521_v2  ;;  %v1524_v13 = vld [vmem:[%s2117_s1 + $0x48] sm:$0xff]  ;;  %v1523_v15 = vld [vmem:[%s2117_s1 + $0x40] sm:$0xff]  ;;  %v1486_v29 = vld [vmem:[%s1907_s26 + $0x14] sm:$0xf0]  ;;  %s1147_s18 = sshll.u32 %s2002_s14, 4  ;;  %s1716_s5 = sshra.s32 %s1150_s29, 4  ;;  %s1148_s18 = int_to_ptr.vmem [resolvable:$true] %s1147_s18  ;;  %s1717_s5 = int_to_ptr.hbm [resolvable:$true] %s1716_s5 }
  0x1a   : > { %778 = vmatpush.bf16.msra.mxu1 %v1529_v3  ;;  %1636 = vmatpush.bf16.msra.mxu3 %v1529_v3  ;;  %v1287_v16 = vld [vmem:[%s1907_s26] sm:$0xf]  ;;  %v1484_v17 = vld [vmem:[%s1907_s26 + $0x4] sm:$0xf0]  ;;  %v1483_v20 = vld [vmem:[%s1907_s26 + $0x4] sm:$0xf]  ;;  %v1296_v36 = vor.u32 %v1486_v29, %v1295_v28  ;;  %p1723_p1 = scmp.lt.s32.totalorder %s1717_s5, %s2120_s4 }
  0x1b   : > { %v1351_v18 = vld [vmem:[%s1907_s26 + $0x80] sm:$0xf]  ;;  %v1500_v19 = vld [vmem:[%s1907_s26 + $0x84] sm:$0xf0]  ;;  %v1289_v21 = vld [vmem:[%s1907_s26 + $0x8] sm:$0xf0]  ;;  %v1288_v24 = vor.u32 %v1484_v17, %v1287_v16 }
  0x1c   : > { %v1499_v22 = vld [vmem:[%s1907_s26 + $0x84] sm:$0xf]  ;;  %v1353_v23 = vld [vmem:[%s1907_s26 + $0x88] sm:$0xf0]  ;;  %v1352_v25 = vor.u32 %v1500_v19, %v1351_v18  ;;  %v1292_v26 = vor.u32 %v1483_v20, %v1289_v21  ;;  %v1359_v30 = vld [vmem:[%s1907_s26 + $0x90] sm:$0xf] }
  0x1d   : > { %690 = vmatpush.bf16.msra.mxu0 %v1520_v4  ;;  %1629 = vmatpush.bf16.msra.mxu2 %v1520_v4  ;;  %v1356_v27 = vor.u32 %v1499_v22, %v1353_v23  ;;  %v1502_v31 = vld [vmem:[%s1907_s26 + $0x94] sm:$0xf0]  ;;  %v1485_v32 = vld [vmem:[%s1907_s26 + $0x14] sm:$0xf]  ;;  %v1297_v33 = vld [vmem:[%s1907_s26 + $0x18] sm:$0xf0] }
  0x1e   : > { %779 = vmatpush.bf16.msra.mxu1 %v1528_v5  ;;  %1637 = vmatpush.bf16.msra.mxu3 %v1528_v5  ;;  %v1501_v34 = vld [vmem:[%s1907_s26 + $0x94] sm:$0xf]  ;;  %v1361_v35 = vld [vmem:[%s1907_s26 + $0x98] sm:$0xf0]  ;;  %v1360_v37 = vor.u32 %v1502_v31, %v1359_v30  ;;  %v1300_v38 = vor.u32 %v1485_v32, %v1297_v33  ;;  %v1303_v40 = vld [vmem:[%s1907_s26 + $0x20] sm:$0xf] }
  0x1f   : > { %v1364_v39 = vor.u32 %v1501_v34, %v1361_v35  ;;  %v1488_v41 = vld [vmem:[%s1907_s26 + $0x24] sm:$0xf0]  ;;  %v1367_v42 = vld [vmem:[%s1907_s26 + $0xa0] sm:$0xf]  ;;  %v1487_v44 = vld [vmem:[%s1907_s26 + $0x24] sm:$0xf] }
  0x20   : > { %v1504_v43 = vld [vmem:[%s1907_s26 + $0xa4] sm:$0xf0]  ;;  %v1305_v45 = vld [vmem:[%s1907_s26 + $0x28] sm:$0xf0]  ;;  %v1503_v46 = vld [vmem:[%s1907_s26 + $0xa4] sm:$0xf]  ;;  %v1304_v48 = vor.u32 %v1488_v41, %v1303_v40 }
  0x21   : > { %691 = vmatpush.bf16.msra.mxu0 %v1519_v6  ;;  %1630 = vmatpush.bf16.msra.mxu2 %v1519_v6  ;;  %v1369_v47 = vld [vmem:[%s1907_s26 + $0xa8] sm:$0xf0]  ;;  %v1368_v49 = vor.u32 %v1504_v43, %v1367_v42  ;;  %v1308_v50 = vor.u32 %v1487_v44, %v1305_v45  ;;  %v1311_v52 = vld [vmem:[%s1907_s26 + $0x30] sm:$0xf]  ;;  %v1490_v53 = vld [vmem:[%s1907_s26 + $0x34] sm:$0xf0] }
  0x22   : > { %780 = vmatpush.bf16.msra.mxu1 %v1527_v7  ;;  %1638 = vmatpush.bf16.msra.mxu3 %v1527_v7  ;;  %v1372_v51 = vor.u32 %v1503_v46, %v1369_v47  ;;  %v1375_v54 = vld [vmem:[%s1907_s26 + $0xb0] sm:$0xf]  ;;  %v1506_v55 = vld [vmem:[%s1907_s26 + $0xb4] sm:$0xf0]  ;;  %v1489_v56 = vld [vmem:[%s1907_s26 + $0x34] sm:$0xf]  ;;  %v1312_v60 = vor.u32 %v1490_v53, %v1311_v52 }
  0x23   : > { %v1313_v57 = vld [vmem:[%s1907_s26 + $0x38] sm:$0xf0]  ;;  %v1505_v58 = vld [vmem:[%s1907_s26 + $0xb4] sm:$0xf]  ;;  %v1376_v61 = vor.u32 %v1506_v55, %v1375_v54  ;;  %v1319_v0 = vld [vmem:[%s1907_s26 + $0x40] sm:$0xf] }
  0x24   : > { %v1377_v59 = vld [vmem:[%s1907_s26 + $0xb8] sm:$0xf0]  ;;  %v1316_v62 = vor.u32 %v1489_v56, %v1313_v57  ;;  %v1492_v1 = vld [vmem:[%s1907_s26 + $0x44] sm:$0xf0]  ;;  %v1383_v2 = vld [vmem:[%s1907_s26 + $0xc0] sm:$0xf] }
  0x25   : > { %692 = vmatpush.bf16.msra.mxu0 %v1518_v8  ;;  %1631 = vmatpush.bf16.msra.mxu2 %v1518_v8  ;;  %v1380_v63 = vor.u32 %v1505_v58, %v1377_v59  ;;  %v1508_v3 = vld [vmem:[%s1907_s26 + $0xc4] sm:$0xf0]  ;;  %v1491_v4 = vld [vmem:[%s1907_s26 + $0x44] sm:$0xf]  ;;  %v1321_v5 = vld [vmem:[%s1907_s26 + $0x48] sm:$0xf0]  ;;  %v1320_v8 = vor.u32 %v1492_v1, %v1319_v0 }
  0x26   : > { %781 = vmatpush.bf16.msra.mxu1 %v1526_v9  ;;  %1639 = vmatpush.bf16.msra.mxu3 %v1526_v9  ;;  %v1507_v6 = vld [vmem:[%s1907_s26 + $0xc4] sm:$0xf]  ;;  %v1385_v7 = vld [vmem:[%s1907_s26 + $0xc8] sm:$0xf0]  ;;  %v1384_v9 = vor.u32 %v1508_v3, %v1383_v2  ;;  %v1493_v16 = vld [vmem:[%s1907_s26 + $0x54] sm:$0xf] }
  0x27   : > { %v1329_v17 = vld [vmem:[%s1907_s26 + $0x58] sm:$0xf0]  ;;  %v1509_v18 = vld [vmem:[%s1907_s26 + $0xd4] sm:$0xf]  ;;  %v1495_v28 = vld [vmem:[%s1907_s26 + $0x64] sm:$0xf] }
  0x28   : > { %v1393_v19 = vld [vmem:[%s1907_s26 + $0xd8] sm:$0xf0]  ;;  %v1332_v22 = vor.u32 %v1493_v16, %v1329_v17  ;;  %v1337_v29 = vld [vmem:[%s1907_s26 + $0x68] sm:$0xf0]  ;;  %v1511_v30 = vld [vmem:[%s1907_s26 + $0xe4] sm:$0xf] }
  0x29   : > { %693 = vmatpush.bf16.msra.mxu0 %v1517_v10  ;;  %1632 = vmatpush.bf16.msra.mxu2 %v1517_v10  ;;  %v1324_v10 = vor.u32 %v1491_v4, %v1321_v5  ;;  %v1396_v23 = vor.u32 %v1509_v18, %v1393_v19  ;;  %v1401_v31 = vld [vmem:[%s1907_s26 + $0xe8] sm:$0xf0]  ;;  %v1340_v34 = vor.u32 %v1495_v28, %v1337_v29  ;;  %v1497_v40 = vld [vmem:[%s1907_s26 + $0x74] sm:$0xf]  ;;  %v1345_v41 = vld [vmem:[%s1907_s26 + $0x78] sm:$0xf0] }
  0x2a   : > { %782 = vmatpush.bf16.msra.mxu1 %v1525_v11  ;;  %1640 = vmatpush.bf16.msra.mxu3 %v1525_v11  ;;  %v1388_v11 = vor.u32 %v1507_v6, %v1385_v7  ;;  %v1404_v35 = vor.u32 %v1511_v30, %v1401_v31  ;;  %v1513_v42 = vld [vmem:[%s1907_s26 + $0xf4] sm:$0xf]  ;;  %v1409_v43 = vld [vmem:[%s1907_s26 + $0xf8] sm:$0xf0]  ;;  %v1348_v46 = vor.u32 %v1497_v40, %v1345_v41  ;;  %v1991_v55 = vld [vmem:[%s2119_s3] ss:$0 sm:$0xff] }
  0x2b   : > { %v1412_v47 = vor.u32 %v1513_v42, %v1409_v43  ;;  %s1718_s6 = scalar_lea.hbm %s1717_s5, 128 }
  0x2c   : > { %p1719_p12 = scmp.ne.s32.totalorder %s1717_s5, %s1718_s6  ;;  %p1724_p2 = scmp.lt.s32.totalorder %s1722_s9, %s1718_s6 }
  0x2d   : > { %694 = vmatpush.bf16.msra.mxu0 %v1516_v12  ;;  %1633 = vmatpush.bf16.msra.mxu2 %v1516_v12  ;;  %v1327_v12 = vld [vmem:[%s1907_s26 + $0x50] sm:$0xf] }
  0x2e   : > { %783 = vmatpush.bf16.msra.mxu1 %v1524_v13  ;;  %1641 = vmatpush.bf16.msra.mxu3 %v1524_v13  ;;  %v1494_v13 = vld [vmem:[%s1907_s26 + $0x54] sm:$0xf0]  ;;  %p1720_p13 = pnand %p1719_p12, %p1849_p4  ;;  %p1725_p3 = por %p1724_p2, %p1723_p1 }
  0x2f   : > { %v1328_v20 = vor.u32 %v1494_v13, %v1327_v12 }
  0x30   : > { %p1721_p0 = pneg %p1720_p13 }
  0x31   : > { %695 = vmatpush.bf16.msra.mxu0 %v1515_v14  ;;  %1634 = vmatpush.bf16.msra.mxu2 %v1515_v14  ;;  %v1391_v14 = vld [vmem:[%s1907_s26 + $0xd0] sm:$0xf] }
  0x32   : > { %784 = vmatpush.bf16.msra.mxu1 %v1523_v15  ;;  %1642 = vmatpush.bf16.msra.mxu3 %v1523_v15  ;;  %v1510_v15 = vld [vmem:[%s1907_s26 + $0xd4] sm:$0xf0]  ;;  %p1726_p5 = pnand %p1725_p3, %p1721_p0 }
  0x33   : > { %v1392_v21 = vor.u32 %v1510_v15, %v1391_v14 }
  0x34   : > { %696 = vmatmul.bf16.vlgmr.msra.gmra.mxu0 %v1288_v24  ;;  %736 = vmatmul.bf16.vlgmr.msra.gmra.mxu2 %v1352_v25  ;;  %v1335_v24 = vld [vmem:[%s1907_s26 + $0x60] sm:$0xf]  ;;  %v1496_v25 = vld [vmem:[%s1907_s26 + $0x64] sm:$0xf0] }
  0x35   : > { %785 = vmatmul.bf16.vlgmr.msra.gmra.mxu1 %v1292_v26  ;;  %825 = vmatmul.bf16.vlgmr.msra.gmra.mxu3 %v1356_v27  ;;  %v1399_v26 = vld [vmem:[%s1907_s26 + $0xe0] sm:$0xf]  ;;  %v1512_v27 = vld [vmem:[%s1907_s26 + $0xe4] sm:$0xf0]  ;;  %v1336_v32 = vor.u32 %v1496_v25, %v1335_v24 }
  0x36   : > { %v1400_v33 = vor.u32 %v1512_v27, %v1399_v26 }
  0x44   : > { %701 = vmatmul.bf16.gmra.mxu0 %v1296_v36  ;;  %741 = vmatmul.bf16.gmra.mxu2 %v1360_v37  ;;  %v1343_v36 = vld [vmem:[%s1907_s26 + $0x70] sm:$0xf]  ;;  %v1498_v37 = vld [vmem:[%s1907_s26 + $0x74] sm:$0xf0] }
  0x45   : > { %790 = vmatmul.bf16.gmra.mxu1 %v1300_v38  ;;  %830 = vmatmul.bf16.gmra.mxu3 %v1364_v39  ;;  %v1407_v38 = vld [vmem:[%s1907_s26 + $0xf0] sm:$0xf]  ;;  %v1514_v39 = vld [vmem:[%s1907_s26 + $0xf4] sm:$0xf0]  ;;  %v1344_v44 = vor.u32 %v1498_v37, %v1343_v36 }
  0x46   : > { %v1408_v45 = vor.u32 %v1514_v39, %v1407_v38 }
  0x54   : > { %706 = vmatmul.bf16.gmra.mxu0 %v1304_v48  ;;  %746 = vmatmul.bf16.gmra.mxu2 %v1368_v49 }
  0x55   : > { %795 = vmatmul.bf16.gmra.mxu1 %v1308_v50  ;;  %835 = vmatmul.bf16.gmra.mxu3 %v1372_v51  ;;  %v1985_v51 = vld [vmem:[%s2118_s2] ss:$0 sm:$0xff] }
  0x64   : > { %711 = vmatmul.bf16.gmra.mxu0 %v1312_v60  ;;  %751 = vmatmul.bf16.gmra.mxu2 %v1376_v61 }
  0x65   : > { %800 = vmatmul.bf16.gmra.mxu1 %v1316_v62  ;;  %840 = vmatmul.bf16.gmra.mxu3 %v1380_v63 }
  0x74   : > { %716 = vmatmul.bf16.gmra.mxu0 %v1320_v8  ;;  %756 = vmatmul.bf16.gmra.mxu2 %v1384_v9 }
  0x75   : > { %805 = vmatmul.bf16.gmra.mxu1 %v1324_v10  ;;  %845 = vmatmul.bf16.gmra.mxu3 %v1388_v11 }
  0x84   : > { %721 = vmatmul.bf16.gmra.mxu0 %v1328_v20  ;;  %761 = vmatmul.bf16.gmra.mxu2 %v1392_v21 }
  0x85   : > { %810 = vmatmul.bf16.gmra.mxu1 %v1332_v22  ;;  %850 = vmatmul.bf16.gmra.mxu3 %v1396_v23 }
  0x94   : > { %726 = vmatmul.bf16.gmra.mxu0 %v1336_v32  ;;  %766 = vmatmul.bf16.gmra.mxu2 %v1400_v33 }
  0x95   : > { %815 = vmatmul.bf16.gmra.mxu1 %v1340_v34  ;;  %855 = vmatmul.bf16.gmra.mxu3 %v1404_v35 }
  0xa4   : > { %731 = vmatmul.bf16.gmra.mxu0 %v1344_v44  ;;  %771 = vmatmul.bf16.gmra.mxu2 %v1408_v45 }
  0xa5   : > { %820 = vmatmul.bf16.gmra.mxu1 %v1348_v46  ;;  %860 = vmatmul.bf16.gmra.mxu3 %v1412_v47 }
  0xb1   : > { %v697_v48 = vpop.f32.mrf.mxu0 }
  0xb2   : > { %v786_v49 = vpop.f32.mrf.mxu1 }
  0xb3   : > { %v787_v50 = vadd.f32 %v786_v49, %v697_v48 }
  0xb5   : > { %v969_v54 = vmul.f32 %v1985_v51, %v787_v50 }
  0xb7   : > { %v737_v52 = vpop.f32.mrf.mxu2  ;;  %v1005_v60 = vadd.f32 %v1991_v55, %v969_v54 }
  0xb8   : > { %v826_v53 = vpop.f32.mrf.mxu3 }
  0xb9   : > { %v699_v56 = vpop.f32.mrf.mxu0  ;;  %v827_v58 = vadd.f32 %v826_v53, %v737_v52  ;;  %v1037_v2 = vmax.f32 %v1005_v60, 0.0 }
  0xba   : > { %v788_v57 = vpop.f32.mrf.mxu1 }
  0xbb   : > { %v789_v59 = vadd.f32 %v788_v57, %v699_v56  ;;  %v985_v62 = vmul.f32 %v1985_v51, %v827_v58 }
  0xbd   : > { %v970_v61 = vmul.f32 %v1985_v51, %v789_v59  ;;  %v1021_v7 = vadd.f32 %v1991_v55, %v985_v62 }
  0xbf   : > { %v1006_v63 = vadd.f32 %v1991_v55, %v970_v61  ;;  %v739_v0 = vpop.f32.mrf.mxu2  ;;  %v1053_v12 = vmax.f32 %v1021_v7, 0.0 }
  0xc0   : > { %v828_v1 = vpop.f32.mrf.mxu3 }
  0xc1   : > { %v1038_v3 = vmax.f32 %v1006_v63, 0.0  ;;  %v829_v4 = vadd.f32 %v828_v1, %v739_v0  ;;  %v702_v5 = vpop.f32.mrf.mxu0 }
  0xc2   : > { %v791_v6 = vpop.f32.mrf.mxu1 }
  0xc3   : > { %v1535_v8 = vpack.c.bf16 %v1038_v3, %v1037_v2  ;;  %v986_v9 = vmul.f32 %v1985_v51, %v829_v4  ;;  %v792_v11 = vadd.f32 %v791_v6, %v702_v5 }
  0xc5   : > { %1536 = vst [vmem:[%s2002_s14] sm:$0xff] %v1535_v8   ;;  %v1022_v10 = vadd.f32 %v1991_v55, %v986_v9  ;;  %v971_v17 = vmul.f32 %v1985_v51, %v792_v11 }
  0xc7   : > { %v1054_v13 = vmax.f32 %v1022_v10, 0.0  ;;  %v742_v14 = vpop.f32.mrf.mxu2  ;;  %v1007_v22 = vadd.f32 %v1991_v55, %v971_v17 }
  0xc8   : > { %v831_v15 = vpop.f32.mrf.mxu3 }
  0xc9   : > { %v1575_v16 = vpack.c.bf16 %v1054_v13, %v1053_v12  ;;  %v704_v18 = vpop.f32.mrf.mxu0  ;;  %v832_v20 = vadd.f32 %v831_v15, %v742_v14  ;;  %v1039_v28 = vmax.f32 %v1007_v22, 0.0 }
  0xca   : > { %v793_v19 = vpop.f32.mrf.mxu1 }
  0xcb   : > { %1619 = vst [vmem:[%s2002_s14 + $0x40] sm:$0xff] %v1575_v16   ;;  %v794_v21 = vadd.f32 %v793_v19, %v704_v18  ;;  %v987_v24 = vmul.f32 %v1985_v51, %v832_v20 }
  0xcd   : > { %v972_v23 = vmul.f32 %v1985_v51, %v794_v21  ;;  %v1023_v33 = vadd.f32 %v1991_v55, %v987_v24 }
  0xcf   : > { %v1008_v25 = vadd.f32 %v1991_v55, %v972_v23  ;;  %v744_v26 = vpop.f32.mrf.mxu2  ;;  %v1055_v38 = vmax.f32 %v1023_v33, 0.0 }
  0xd0   : > { %v833_v27 = vpop.f32.mrf.mxu3 }
  0xd1   : > { %v1040_v29 = vmax.f32 %v1008_v25, 0.0  ;;  %v834_v30 = vadd.f32 %v833_v27, %v744_v26  ;;  %v707_v31 = vpop.f32.mrf.mxu0 }
  0xd2   : > { %v796_v32 = vpop.f32.mrf.mxu1 }
  0xd3   : > { %v1540_v34 = vpack.c.bf16 %v1040_v29, %v1039_v28  ;;  %v988_v35 = vmul.f32 %v1985_v51, %v834_v30  ;;  %v797_v37 = vadd.f32 %v796_v32, %v707_v31 }
  0xd5   : > { %1612 = vst [vmem:[%s2002_s14 + $0x8] sm:$0xff] %v1540_v34   ;;  %v1024_v36 = vadd.f32 %v1991_v55, %v988_v35  ;;  %v973_v43 = vmul.f32 %v1985_v51, %v797_v37 }
  0xd7   : > { %v1056_v39 = vmax.f32 %v1024_v36, 0.0  ;;  %v747_v40 = vpop.f32.mrf.mxu2  ;;  %v1009_v48 = vadd.f32 %v1991_v55, %v973_v43 }
  0xd8   : > { %v836_v41 = vpop.f32.mrf.mxu3 }
  0xd9   : > { %v1580_v42 = vpack.c.bf16 %v1056_v39, %v1055_v38  ;;  %v709_v44 = vpop.f32.mrf.mxu0  ;;  %v837_v46 = vadd.f32 %v836_v41, %v747_v40  ;;  %v1041_v56 = vmax.f32 %v1009_v48, 0.0 }
  0xda   : > { %v798_v45 = vpop.f32.mrf.mxu1 }
  0xdb   : > { %1620 = vst [vmem:[%s2002_s14 + $0x48] sm:$0xff] %v1580_v42   ;;  %v799_v47 = vadd.f32 %v798_v45, %v709_v44  ;;  %v989_v50 = vmul.f32 %v1985_v51, %v837_v46 }
  0xdd   : > { %v974_v49 = vmul.f32 %v1985_v51, %v799_v47  ;;  %v1025_v61 = vadd.f32 %v1991_v55, %v989_v50 }
  0xdf   : > { %v1010_v52 = vadd.f32 %v1991_v55, %v974_v49  ;;  %v749_v53 = vpop.f32.mrf.mxu2  ;;  %v1057_v2 = vmax.f32 %v1025_v61, 0.0 }
  0xe0   : > { %v838_v54 = vpop.f32.mrf.mxu3 }
  0xe1   : > { %v1042_v57 = vmax.f32 %v1010_v52, 0.0  ;;  %v839_v58 = vadd.f32 %v838_v54, %v749_v53  ;;  %v712_v59 = vpop.f32.mrf.mxu0 }
  0xe2   : > { %v801_v60 = vpop.f32.mrf.mxu1 }
  0xe3   : > { %v1545_v62 = vpack.c.bf16 %v1042_v57, %v1041_v56  ;;  %v990_v63 = vmul.f32 %v1985_v51, %v839_v58  ;;  %v802_v1 = vadd.f32 %v801_v60, %v712_v59 }
  0xe5   : > { %1613 = vst [vmem:[%s2002_s14 + $0x10] sm:$0xff] %v1545_v62   ;;  %v1026_v0 = vadd.f32 %v1991_v55, %v990_v63  ;;  %v975_v7 = vmul.f32 %v1985_v51, %v802_v1 }
  0xe7   : > { %v1058_v3 = vmax.f32 %v1026_v0, 0.0  ;;  %v752_v4 = vpop.f32.mrf.mxu2  ;;  %v1011_v12 = vadd.f32 %v1991_v55, %v975_v7 }
  0xe8   : > { %v841_v5 = vpop.f32.mrf.mxu3 }
  0xe9   : > { %v1585_v6 = vpack.c.bf16 %v1058_v3, %v1057_v2  ;;  %v714_v8 = vpop.f32.mrf.mxu0  ;;  %v842_v10 = vadd.f32 %v841_v5, %v752_v4  ;;  %v1043_v18 = vmax.f32 %v1011_v12, 0.0 }
  0xea   : > { %v803_v9 = vpop.f32.mrf.mxu1 }
  0xeb   : > { %1621 = vst [vmem:[%s2002_s14 + $0x50] sm:$0xff] %v1585_v6   ;;  %v804_v11 = vadd.f32 %v803_v9, %v714_v8  ;;  %v991_v14 = vmul.f32 %v1985_v51, %v842_v10 }
  0xed   : > { %v976_v13 = vmul.f32 %v1985_v51, %v804_v11  ;;  %v1027_v23 = vadd.f32 %v1991_v55, %v991_v14 }
  0xef   : > { %v1012_v15 = vadd.f32 %v1991_v55, %v976_v13  ;;  %v754_v16 = vpop.f32.mrf.mxu2  ;;  %v1059_v28 = vmax.f32 %v1027_v23, 0.0 }
  0xf0   : > { %v843_v17 = vpop.f32.mrf.mxu3 }
  0xf1   : > { %v1044_v19 = vmax.f32 %v1012_v15, 0.0  ;;  %v844_v20 = vadd.f32 %v843_v17, %v754_v16  ;;  %v717_v21 = vpop.f32.mrf.mxu0 }
  0xf2   : > { %v806_v22 = vpop.f32.mrf.mxu1 }
  0xf3   : > { %v1550_v24 = vpack.c.bf16 %v1044_v19, %v1043_v18  ;;  %v992_v25 = vmul.f32 %v1985_v51, %v844_v20  ;;  %v807_v27 = vadd.f32 %v806_v22, %v717_v21 }
  0xf5   : > { %1614 = vst [vmem:[%s2002_s14 + $0x18] sm:$0xff] %v1550_v24   ;;  %v1028_v26 = vadd.f32 %v1991_v55, %v992_v25  ;;  %v977_v33 = vmul.f32 %v1985_v51, %v807_v27 }
  0xf7   : > { %v1060_v29 = vmax.f32 %v1028_v26, 0.0  ;;  %v757_v30 = vpop.f32.mrf.mxu2  ;;  %v1013_v38 = vadd.f32 %v1991_v55, %v977_v33 }
  0xf8   : > { %v846_v31 = vpop.f32.mrf.mxu3 }
  0xf9   : > { %v1590_v32 = vpack.c.bf16 %v1060_v29, %v1059_v28  ;;  %v719_v34 = vpop.f32.mrf.mxu0  ;;  %v847_v36 = vadd.f32 %v846_v31, %v757_v30  ;;  %v1045_v44 = vmax.f32 %v1013_v38, 0.0 }
  0xfa   : > { %v808_v35 = vpop.f32.mrf.mxu1 }
  0xfb   : > { %1622 = vst [vmem:[%s2002_s14 + $0x58] sm:$0xff] %v1590_v32   ;;  %v809_v37 = vadd.f32 %v808_v35, %v719_v34  ;;  %v993_v40 = vmul.f32 %v1985_v51, %v847_v36 }
  0xfd   : > { %v978_v39 = vmul.f32 %v1985_v51, %v809_v37  ;;  %v1029_v49 = vadd.f32 %v1991_v55, %v993_v40 }
  0xff   : > { %v1014_v41 = vadd.f32 %v1991_v55, %v978_v39  ;;  %v759_v42 = vpop.f32.mrf.mxu2  ;;  %v1061_v56 = vmax.f32 %v1029_v49, 0.0 }
 0x100   : > { %v848_v43 = vpop.f32.mrf.mxu3 }
 0x101   : > { %v1046_v45 = vmax.f32 %v1014_v41, 0.0  ;;  %v849_v46 = vadd.f32 %v848_v43, %v759_v42  ;;  %v722_v47 = vpop.f32.mrf.mxu0 }
 0x102   : > { %v811_v48 = vpop.f32.mrf.mxu1 }
 0x103   : > { %v1555_v50 = vpack.c.bf16 %v1046_v45, %v1045_v44  ;;  %v994_v52 = vmul.f32 %v1985_v51, %v849_v46  ;;  %v812_v54 = vadd.f32 %v811_v48, %v722_v47 }
 0x105   : > { %1615 = vst [vmem:[%s2002_s14 + $0x20] sm:$0xff] %v1555_v50   ;;  %v1030_v53 = vadd.f32 %v1991_v55, %v994_v52  ;;  %v979_v61 = vmul.f32 %v1985_v51, %v812_v54 }
 0x107   : > { %v1062_v57 = vmax.f32 %v1030_v53, 0.0  ;;  %v762_v58 = vpop.f32.mrf.mxu2  ;;  %v1015_v2 = vadd.f32 %v1991_v55, %v979_v61 }
 0x108   : > { %v851_v59 = vpop.f32.mrf.mxu3 }
 0x109   : > { %v1595_v60 = vpack.c.bf16 %v1062_v57, %v1061_v56  ;;  %v724_v62 = vpop.f32.mrf.mxu0  ;;  %v852_v0 = vadd.f32 %v851_v59, %v762_v58  ;;  %v1047_v8 = vmax.f32 %v1015_v2, 0.0 }
 0x10a   : > { %v813_v63 = vpop.f32.mrf.mxu1 }
 0x10b   : > { %1623 = vst [vmem:[%s2002_s14 + $0x60] sm:$0xff] %v1595_v60   ;;  %v814_v1 = vadd.f32 %v813_v63, %v724_v62  ;;  %v995_v4 = vmul.f32 %v1985_v51, %v852_v0 }
 0x10d   : > { %v980_v3 = vmul.f32 %v1985_v51, %v814_v1  ;;  %v1031_v13 = vadd.f32 %v1991_v55, %v995_v4 }
 0x10f   : > { %v1016_v5 = vadd.f32 %v1991_v55, %v980_v3  ;;  %v764_v6 = vpop.f32.mrf.mxu2  ;;  %v1063_v18 = vmax.f32 %v1031_v13, 0.0 }
 0x110   : > { %v853_v7 = vpop.f32.mrf.mxu3 }
 0x111   : > { %v1048_v9 = vmax.f32 %v1016_v5, 0.0  ;;  %v854_v10 = vadd.f32 %v853_v7, %v764_v6  ;;  %v727_v11 = vpop.f32.mrf.mxu0 }
 0x112   : > { %v816_v12 = vpop.f32.mrf.mxu1 }
 0x113   : > { %v1560_v14 = vpack.c.bf16 %v1048_v9, %v1047_v8  ;;  %v996_v15 = vmul.f32 %v1985_v51, %v854_v10  ;;  %v817_v17 = vadd.f32 %v816_v12, %v727_v11 }
 0x115   : > { %1616 = vst [vmem:[%s2002_s14 + $0x28] sm:$0xff] %v1560_v14   ;;  %v1032_v16 = vadd.f32 %v1991_v55, %v996_v15  ;;  %v981_v23 = vmul.f32 %v1985_v51, %v817_v17 }
 0x117   : > { %v1064_v19 = vmax.f32 %v1032_v16, 0.0  ;;  %v767_v20 = vpop.f32.mrf.mxu2  ;;  %v1017_v28 = vadd.f32 %v1991_v55, %v981_v23 }
 0x118   : > { %v856_v21 = vpop.f32.mrf.mxu3 }
 0x119   : > { %v1600_v22 = vpack.c.bf16 %v1064_v19, %v1063_v18  ;;  %v729_v24 = vpop.f32.mrf.mxu0  ;;  %v857_v26 = vadd.f32 %v856_v21, %v767_v20  ;;  %v1049_v34 = vmax.f32 %v1017_v28, 0.0 }
 0x11a   : > { %v818_v25 = vpop.f32.mrf.mxu1 }
 0x11b   : > { %1624 = vst [vmem:[%s2002_s14 + $0x68] sm:$0xff] %v1600_v22   ;;  %v819_v27 = vadd.f32 %v818_v25, %v729_v24  ;;  %v997_v30 = vmul.f32 %v1985_v51, %v857_v26 }
 0x11d   : > { %v982_v29 = vmul.f32 %v1985_v51, %v819_v27  ;;  %v1033_v39 = vadd.f32 %v1991_v55, %v997_v30 }
 0x11f   : > { %v1018_v31 = vadd.f32 %v1991_v55, %v982_v29  ;;  %v769_v32 = vpop.f32.mrf.mxu2  ;;  %v1065_v44 = vmax.f32 %v1033_v39, 0.0 }
 0x120   : > { %v858_v33 = vpop.f32.mrf.mxu3 }
 0x121   : > { %v1050_v35 = vmax.f32 %v1018_v31, 0.0  ;;  %v859_v36 = vadd.f32 %v858_v33, %v769_v32  ;;  %v732_v37 = vpop.f32.mrf.mxu0 }
 0x122   : > { %v821_v38 = vpop.f32.mrf.mxu1 }
 0x123   : > { %v1565_v40 = vpack.c.bf16 %v1050_v35, %v1049_v34  ;;  %v998_v41 = vmul.f32 %v1985_v51, %v859_v36  ;;  %v822_v43 = vadd.f32 %v821_v38, %v732_v37 }
 0x125   : > { %1617 = vst [vmem:[%s2002_s14 + $0x30] sm:$0xff] %v1565_v40   ;;  %v1034_v42 = vadd.f32 %v1991_v55, %v998_v41  ;;  %v983_v49 = vmul.f32 %v1985_v51, %v822_v43 }
 0x127   : > { %v1066_v45 = vmax.f32 %v1034_v42, 0.0  ;;  %v772_v46 = vpop.f32.mrf.mxu2  ;;  %v1019_v56 = vadd.f32 %v1991_v55, %v983_v49 }
 0x128   : > { %v861_v47 = vpop.f32.mrf.mxu3 }
 0x129   : > { %v1605_v48 = vpack.c.bf16 %v1066_v45, %v1065_v44  ;;  %v734_v50 = vpop.f32.mrf.mxu0  ;;  %v862_v53 = vadd.f32 %v861_v47, %v772_v46  ;;  %v1051_v62 = vmax.f32 %v1019_v56, 0.0 }
 0x12a   : > { %v823_v52 = vpop.f32.mrf.mxu1 }
 0x12b   : > { %1625 = vst [vmem:[%s2002_s14 + $0x70] sm:$0xff] %v1605_v48   ;;  %v824_v54 = vadd.f32 %v823_v52, %v734_v50  ;;  %v999_v58 = vmul.f32 %v1985_v51, %v862_v53 }
 0x12d   : > { %v984_v57 = vmul.f32 %v1985_v51, %v824_v54  ;;  %v1035_v1 = vadd.f32 %v1991_v55, %v999_v58 }
 0x12f   : > { %v1020_v59 = vadd.f32 %v1991_v55, %v984_v57  ;;  %v774_v60 = vpop.f32.mrf.mxu2  ;;  %v1067_v5 = vmax.f32 %v1035_v1, 0.0 }
 0x130   : > { %v863_v61 = vpop.f32.mrf.mxu3 }
 0x131   : > { %v1052_v63 = vmax.f32 %v1020_v59, 0.0  ;;  %v864_v0 = vadd.f32 %v863_v61, %v774_v60 }
 0x133   : > { %v1570_v2 = vpack.c.bf16 %v1052_v63, %v1051_v62  ;;  %v1000_v3 = vmul.f32 %v1985_v51, %v864_v0 }
 0x135   : > { %1618 = vst [vmem:[%s2002_s14 + $0x38] sm:$0xff] %v1570_v2   ;;  %v1036_v4 = vadd.f32 %v1991_v55, %v1000_v3 }
 0x137   : > { %v1068_v6 = vmax.f32 %v1036_v4, 0.0 }
 0x139   : > { %v1610_v7 = vpack.c.bf16 %v1068_v6, %v1067_v5 }
 0x13b   : > { %1626 = vst [vmem:[%s2002_s14 + $0x78] sm:$0xff] %v1610_v7  }
 0x13c   : > { %1729 = shalt.err (!%p1726_p5)
}
 0x13d   : > { %s1782_s12 = smov 64   ;;  %s1783_s13 = smov 4  }
 0x13e   : > { %1643 = dma.vmem_to_hbm [thread:$0]  (%p1849_p4), %s1148_s18, 2048, %s1150_s29, %s1134_s30, %s1782_s12, %s1782_s12, %s1783_s13  }
 0x13f PF: > { %p1649_p6 = scmp.ge.s32.totalorder %s1780_s20, 2  ;;  %s1164_s14 = sand.u32 1, %s1760_s15  }
 0x140   : > { %s1165_s22 = scalar_lea.sflag [#allocation4], %s1164_s14 }
 0x141   : > { %p1646_p7 = pnand %p1649_p6, %p1856_p8 }
 0x143   : > { %p1647_p9 = pneg %p1646_p7 }
 0x145   : > { %1755 = dma.done.wait (%p1647_p9), %s1165_s22, 2048  }
 0x146   : > { %1757 = vsyncadd (%p1647_p9), %s1165_s22, 4294965248  ;;  %s17_s20 = sadd.s32 1, %s1780_s20   ;;  %s2123_s15 = smov %s1764_s16 }
 0x147   : > { %p14_p10 = scmp.ge.s32.totalorder %s17_s20, 4   ;;  %s2124_s16 = smov %s1768_s17 }
 0x148   : > { %s2125_s17 = smov %s1862_s28  ;;  %s2126_s18 = smov %s1776_s19 }
 0x149   : > { %s2127_s19 = smov %s2129_s23  ;;  %16 = sbr.rel (!%p14_p10) target bundleno = 4 (0x4), region = 88 }
 0x14e   :  { %1171 = vsyncpa [#allocation4], 1 }
 0x14f   :  { %1173 = vsyncpa [#allocation4 + $0x1], 1 }

</bundles_post_ra>
